<compile_context>
chip_gen: v7x
topology: tpu7x:2x2x1
jax: 0.10.0
libtpu: 0.0.40
codegen_flags: <defaults>
</compile_context>

<pallas_src>
import functools

import jax
import jax.numpy as jnp
from jax.experimental import pallas as pl
from jax.experimental.pallas import tpu as pltpu

LANE = 128


def _semantic_loss_kernel(x_ref, t_ref, out_ref, *,
                          alpha, gamma, total, block_rows, inner_pp):
    p = pl.program_id(0)          # megacore partition axis ("parallel")
    i = pl.program_id(1)          # reduction axis within a partition

    @pl.when(i == 0)
    def _():
        out_ref[...] = jnp.zeros_like(out_ref)

    # In-kernel validity mask (replaces a 4th DMA'd mask stream).  Logical
    # block index may point past the real data for clamped duplicate blocks of
    # the last partition; those elements become valid == False everywhere.
    # NOTE: int32 flat index -> fine for < 2^31 elements.
    row_start = (p * inner_pp + i) * block_rows
    row_ids = jax.lax.broadcasted_iota(jnp.int32, (block_rows, LANE), 0) + row_start
    col_ids = jax.lax.broadcasted_iota(jnp.int32, (block_rows, LANE), 1)
    valid = (row_ids * LANE + col_ids) < total

    x = x_ref[...].astype(jnp.float32)
    t = t_ref[...].astype(jnp.float32)

    m1 = jnp.logical_and(t == 1.0, valid)      # targets == 1 (pos_mask == 1)
    m0 = jnp.logical_and(t == 0.0, valid)      # targets == 0 (pos_mask == 0)
    m1f = m1.astype(jnp.float32)
    m0f = m0.astype(jnp.float32)

    # Sanitize x so garbage from ragged / duplicate blocks cannot poison sums.
    xs = jnp.where(valid, x, 0.0)

    # One EUP log per element: pick the argument required by the population
    # the element belongs to; 1.0 (log -> 0) everywhere else.
    log_arg = jnp.where(m1, xs + 1e-08, jnp.where(m0, 1.0 - xs + 1e-08, 1.0))
    lb = jnp.log(log_arg)

    # focal_loss restricted to each population (gamma is a Python int):
    #   targets == 1: -alpha       * (1 - x)^gamma * log(x + 1e-8)
    #   targets == 0: -(1 - alpha) *      x ^gamma * log(1 - x + 1e-8)
    f1 = (-alpha) * ((1.0 - xs) ** gamma) * lb
    f0 = (-(1.0 - alpha)) * (xs ** gamma) * lb

    # Single full-vreg accumulator update: rows = [sum1, sum0, cnt1, cnt0, 0x4].
    update = jnp.concatenate([
        jnp.sum(f1 * m1f, axis=0, keepdims=True),
        jnp.sum(f0 * m0f, axis=0, keepdims=True),
        jnp.sum(m1f, axis=0, keepdims=True),
        jnp.sum(m0f, axis=0, keepdims=True),
        jnp.zeros((4, LANE), jnp.float32),
    ], axis=0)
    out_ref[...] += update[None]


def semantic_loss(inputs, targets, alpha=0.5, gamma=2,
                  block_rows=1024, num_parts=2):
    """Pallas implementation of SemanticLoss.forward. Returns a scalar f32."""
    total = int(inputs.size)              # static: baked into the kernel
    x = inputs.reshape(-1)                # keep HBM dtype; cast in-kernel
    t = targets.reshape(-1)

    # Minimal tail padding, only when the flat length is not lane aligned.
    # (Typical NCHW shapes with H*W % 128 == 0 hit the zero-copy path; the
    # row-block raggedness is handled in-kernel, not by padding.)
    rem = total % LANE
    if rem != 0:
        pad = LANE - rem
        x = jnp.pad(x, (0, pad))
        t = jnp.pad(t, (0, pad))

    rows = x.shape[0] // LANE
    x2 = x.reshape(rows, LANE)
    t2 = t.reshape(rows, LANE)

    block_rows = min(block_rows, rows)          # full extent for tiny inputs
    inner = pl.cdiv(rows, block_rows)           # number of real row blocks
    num_parts = max(1, min(num_parts, inner))   # megacore partitions (v7x)
    inner_pp = pl.cdiv(inner, num_parts)

    def in_map(p, i):
        # Clamp so logical positions past the real data re-read the last real
        # block (never an out-of-bounds DMA); the in-kernel validity mask
        # zeroes their contribution.
        return (jnp.minimum(p * inner_pp + i, inner - 1), 0)

    in_spec = pl.BlockSpec((block_rows, LANE), in_map)

    kernel = functools.partial(
        _semantic_loss_kernel, alpha=float(alpha), gamma=gamma,
        total=total, block_rows=block_rows, inner_pp=inner_pp)

    partial = pl.pallas_call(
        kernel,
        out_shape=jax.ShapeDtypeStruct((num_parts, 8, LANE), jnp.float32),
        grid_spec=pltpu.PrefetchScalarGridSpec(
            num_scalar_prefetch=0,
            grid=(num_parts, inner_pp),
            in_specs=[in_spec, in_spec],
            out_specs=pl.BlockSpec((1, 8, LANE), lambda p, i: (p, 0, 0)),
        ),
        compiler_params=pltpu.CompilerParams(
            dimension_semantics=("parallel", "arbitrary")),
    )(x2, t2)

    # Tiny final reduction (8 lanes x num_parts rows) in plain JAX.
    r = jnp.sum(partial, axis=(0, 2))           # (8,)
    sem_loss_1 = r[0] / r[2]                    # mean over targets == 1
    sem_loss_0 = r[1] / r[3]                    # mean over targets == 0
    return (sem_loss_0 + sem_loss_1) * 0.5


def semantic_loss_ref(inputs, targets, alpha=0.5, gamma=2):
    """Pure-JAX reference mirroring the PyTorch module."""
    inputs = inputs.astype(jnp.float32)
    targets = targets.astype(jnp.float32)
    pos = (targets >= 0.4).astype(jnp.float32)
    focal = (-pos * alpha * (1.0 - inputs) ** gamma * jnp.log(inputs + 1e-08)
             - (1.0 - pos) * (1.0 - alpha) * inputs ** gamma
             * jnp.log(1.0 - inputs + 1e-08))
    m0 = targets == 0.0
    m1 = targets == 1.0
    l0 = jnp.sum(jnp.where(m0, focal, 0.0)) / jnp.sum(m0)
    l1 = jnp.sum(jnp.where(m1, focal, 0.0)) / jnp.sum(m1)
    return (l0 + l1) / 2.0


if __name__ == "__main__":
    key = jax.random.PRNGKey(0)

    def make_case(k, shape, dtype):
        k1, k2 = jax.random.split(k)
        inp = jax.random.uniform(k1, shape, jnp.float32, minval=0.05, maxval=0.95)
        r = jax.random.uniform(k2, shape, jnp.float32)
        tgt = jnp.where(r < 0.4, 0.0, jnp.where(r < 0.8, 1.0, r))
        return inp.astype(dtype), tgt.astype(dtype)

    cases = [
        ((2, 4, 16, 16), jnp.float32),    # lane-aligned NCHW-like (zero-copy path)
        ((3, 5, 17, 13), jnp.float32),    # unaligned total -> ragged-tail masking
        ((5, 16, 64, 64), jnp.bfloat16),  # multi-block, 2 partitions + clamped tail,
                                          # narrow HBM dtype upcast in-kernel
    ]
    keys = jax.random.split(key, len(cases))
    for k, (shape, dtype) in zip(keys, cases):
        inputs, targets = make_case(k, shape, dtype)
        loss = jax.block_until_ready(semantic_loss(inputs, targets,
                                                   alpha=0.5, gamma=2))
        ref = semantic_loss_ref(inputs, targets, alpha=0.5, gamma=2)
        assert jnp.allclose(loss, ref, rtol=1e-4, atol=1e-5), (shape, loss, ref)

    print("KERNEL_OK")
</pallas_src>

<mosaic_0001>
module attributes {stable_mosaic.version = 11 : i64} {
  func.func @_semantic_loss_kernel(%arg0: i32, %arg1: i32, %arg2: memref<16x128xf32, #tpu.memory_space<vmem>>, %arg3: memref<16x128xf32, #tpu.memory_space<vmem>>, %arg4: memref<1x8x128xf32, #tpu.memory_space<vmem>>) attributes {dimension_semantics = [#tpu.dimension_semantics<parallel>, #tpu.dimension_semantics<arbitrary>], iteration_bounds = array<i64: 1, 1>, scalar_prefetch = 0 : i64, scratch_operands = 0 : i64, tpu.core_type = #tpu.core_type<tc>, window_params = [{transform_indices = @transform_0, window_bounds = array<i64: 16, 128>}, {transform_indices = @transform_1, window_bounds = array<i64: 16, 128>}, {transform_indices = @transform_2, window_bounds = array<i64: 1, 8, 128>}]} {
    %c0_i32 = arith.constant 0 : i32
    %0 = arith.cmpi eq, %arg1, %c0_i32 : i32
    %1 = arith.extui %0 : i1 to i32
    %c0_i32_0 = arith.constant 0 : i32
    %2 = arith.cmpi ne, %1, %c0_i32_0 : i32
    scf.if %2 {
      %cst_24 = arith.constant 0.000000e+00 : f32
      %65 = vector.broadcast %cst_24 : f32 to vector<1x8x128xf32>
      %c0_25 = arith.constant 0 : index
      %c0_26 = arith.constant 0 : index
      %c0_27 = arith.constant 0 : index
      %66 = vector.load %arg4[%c0_25, %c0_26, %c0_27] : memref<1x8x128xf32, #tpu.memory_space<vmem>>, vector<1x8x128xf32>
      tpu.vector_store %arg4[%c0_25, %c0_26, %c0_27], %65 {strides = array<i32>} : memref<1x8x128xf32, #tpu.memory_space<vmem>>, vector<1x8x128xf32>,
    } else {
    }
    %c1_i32 = arith.constant 1 : i32
    %3 = arith.muli %arg0, %c1_i32 : i32
    %4 = arith.addi %3, %arg1 : i32
    %c16_i32 = arith.constant 16 : i32
    %5 = arith.muli %4, %c16_i32 : i32
    %6 = tpu.iota {dimensions = array<i32: 0>} : vector<16x128xi32>
    %7 = vector.broadcast %5 : i32 to vector<16x128xi32>
    %8 = arith.addi %6, %7 : vector<16x128xi32>
    %9 = tpu.iota {dimensions = array<i32: 1>} : vector<16x128xi32>
    %c128_i32 = arith.constant 128 : i32
    %10 = vector.broadcast %c128_i32 : i32 to vector<16x128xi32>
    %11 = arith.muli %8, %10 : vector<16x128xi32>
    %12 = arith.addi %11, %9 : vector<16x128xi32>
    %c2048_i32 = arith.constant 2048 : i32
    %13 = vector.broadcast %c2048_i32 : i32 to vector<16x128xi32>
    %14 = arith.cmpi slt, %12, %13 : vector<16x128xi32>
    %c0 = arith.constant 0 : index
    %c0_1 = arith.constant 0 : index
    %15 = vector.load %arg2[%c0, %c0_1] : memref<16x128xf32, #tpu.memory_space<vmem>>, vector<16x128xf32>
    %c0_2 = arith.constant 0 : index
    %c0_3 = arith.constant 0 : index
    %16 = vector.load %arg3[%c0_2, %c0_3] : memref<16x128xf32, #tpu.memory_space<vmem>>, vector<16x128xf32>
    %cst = arith.constant 1.000000e+00 : f32
    %17 = vector.broadcast %cst : f32 to vector<16x128xf32>
    %18 = arith.cmpf oeq, %16, %17 : vector<16x128xf32>
    %19 = arith.andi %18, %14 : vector<16x128xi1>
    %cst_4 = arith.constant 0.000000e+00 : f32
    %20 = vector.broadcast %cst_4 : f32 to vector<16x128xf32>
    %21 = arith.cmpf oeq, %16, %20 : vector<16x128xf32>
    %22 = arith.andi %21, %14 : vector<16x128xi1>
    %23 = arith.extui %19 : vector<16x128xi1> to vector<16x128xi32>
    %24 = arith.sitofp %23 : vector<16x128xi32> to vector<16x128xf32>
    %25 = arith.extui %22 : vector<16x128xi1> to vector<16x128xi32>
    %26 = arith.sitofp %25 : vector<16x128xi32> to vector<16x128xf32>
    %cst_5 = arith.constant 0.000000e+00 : f32
    %27 = vector.broadcast %cst_5 : f32 to vector<16x128xf32>
    %28 = arith.select %14, %15, %27 : vector<16x128xi1>, vector<16x128xf32>
    %cst_6 = arith.constant 9.99999993E-9 : f32
    %29 = vector.broadcast %cst_6 : f32 to vector<16x128xf32>
    %30 = arith.addf %28, %29 : vector<16x128xf32>
    %cst_7 = arith.constant 1.000000e+00 : f32
    %31 = vector.broadcast %cst_7 : f32 to vector<16x128xf32>
    %32 = arith.subf %31, %28 : vector<16x128xf32>
    %cst_8 = arith.constant 9.99999993E-9 : f32
    %33 = vector.broadcast %cst_8 : f32 to vector<16x128xf32>
    %34 = arith.addf %32, %33 : vector<16x128xf32>
    %cst_9 = arith.constant 1.000000e+00 : f32
    %35 = vector.broadcast %cst_9 : f32 to vector<16x128xf32>
    %36 = arith.select %22, %34, %35 : vector<16x128xi1>, vector<16x128xf32>
    %37 = arith.select %19, %30, %36 : vector<16x128xi1>, vector<16x128xf32>
    %38 = math.log %37 : vector<16x128xf32>
    %cst_10 = arith.constant 1.000000e+00 : f32
    %39 = vector.broadcast %cst_10 : f32 to vector<16x128xf32>
    %40 = arith.subf %39, %28 : vector<16x128xf32>
    %41 = arith.mulf %40, %40 : vector<16x128xf32>
    %cst_11 = arith.constant -5.000000e-01 : f32
    %42 = vector.broadcast %cst_11 : f32 to vector<16x128xf32>
    %43 = arith.mulf %42, %41 : vector<16x128xf32>
    %44 = arith.mulf %43, %38 : vector<16x128xf32>
    %45 = arith.mulf %28, %28 : vector<16x128xf32>
    %cst_12 = arith.constant -5.000000e-01 : f32
    %46 = vector.broadcast %cst_12 : f32 to vector<16x128xf32>
    %47 = arith.mulf %46, %45 : vector<16x128xf32>
    %48 = arith.mulf %47, %38 : vector<16x128xf32>
    %49 = arith.mulf %44, %24 : vector<16x128xf32>
    %cst_13 = arith.constant dense<0.000000e+00> : vector<128xf32>
    %50 = vector.multi_reduction <add>, %49, %cst_13 [0] : vector<16x128xf32> to vector<128xf32>
    %51 = vector.shape_cast %50 : vector<128xf32> to vector<1x128xf32>
    %52 = arith.mulf %48, %26 : vector<16x128xf32>
    %cst_14 = arith.constant dense<0.000000e+00> : vector<128xf32>
    %53 = vector.multi_reduction <add>, %52, %cst_14 [0] : vector<16x128xf32> to vector<128xf32>
    %54 = vector.shape_cast %53 : vector<128xf32> to vector<1x128xf32>
    %cst_15 = arith.constant dense<0.000000e+00> : vector<128xf32>
    %55 = vector.multi_reduction <add>, %24, %cst_15 [0] : vector<16x128xf32> to vector<128xf32>
    %56 = vector.shape_cast %55 : vector<128xf32> to vector<1x128xf32>
    %cst_16 = arith.constant dense<0.000000e+00> : vector<128xf32>
    %57 = vector.multi_reduction <add>, %26, %cst_16 [0] : vector<16x128xf32> to vector<128xf32>
    %58 = vector.shape_cast %57 : vector<128xf32> to vector<1x128xf32>
    %cst_17 = arith.constant 0.000000e+00 : f32
    %59 = vector.broadcast %cst_17 : f32 to vector<4x128xf32>
    %60 = tpu.concatenate %51, %54, %56, %58, %59 in 0 : vector<1x128xf32>, vector<1x128xf32>, vector<1x128xf32>, vector<1x128xf32>, vector<4x128xf32> -> vector<8x128xf32>
    %c0_18 = arith.constant 0 : index
    %c0_19 = arith.constant 0 : index
    %c0_20 = arith.constant 0 : index
    %61 = vector.load %arg4[%c0_18, %c0_19, %c0_20] : memref<1x8x128xf32, #tpu.memory_space<vmem>>, vector<1x8x128xf32>
    %62 = vector.shape_cast %60 : vector<8x128xf32> to vector<1x8x128xf32>
    %63 = arith.addf %61, %62 : vector<1x8x128xf32>
    %c0_21 = arith.constant 0 : index
    %c0_22 = arith.constant 0 : index
    %c0_23 = arith.constant 0 : index
    %64 = vector.load %arg4[%c0_21, %c0_22, %c0_23] : memref<1x8x128xf32, #tpu.memory_space<vmem>>, vector<1x8x128xf32>
    tpu.vector_store %arg4[%c0_21, %c0_22, %c0_23], %63 {strides = array<i32>} : memref<1x8x128xf32, #tpu.memory_space<vmem>>, vector<1x8x128xf32>,
    return
  }
  func.func @transform_0(%arg0: i32, %arg1: i32) -> (i32, i32) {
    %c1_i32 = arith.constant 1 : i32
    %0 = arith.muli %arg0, %c1_i32 : i32
    %1 = arith.addi %0, %arg1 : i32
    %c0_i32 = arith.constant 0 : i32
    %2 = arith.minsi %1, %c0_i32 : i32
    %c0_i32_0 = arith.constant 0 : i32
    %c0_i32_1 = arith.constant 0 : i32
    return %2, %c0_i32_0 : i32, i32
  }
  func.func @transform_1(%arg0: i32, %arg1: i32) -> (i32, i32) {
    %c1_i32 = arith.constant 1 : i32
    %0 = arith.muli %arg0, %c1_i32 : i32
    %1 = arith.addi %0, %arg1 : i32
    %c0_i32 = arith.constant 0 : i32
    %2 = arith.minsi %1, %c0_i32 : i32
    %c0_i32_0 = arith.constant 0 : i32
    %c0_i32_1 = arith.constant 0 : i32
    return %2, %c0_i32_0 : i32, i32
  }
  func.func @transform_2(%arg0: i32, %arg1: i32) -> (i32, i32, i32) {
    %c0_i32 = arith.constant 0 : i32
    %c0_i32_0 = arith.constant 0 : i32
    %c0_i32_1 = arith.constant 0 : i32
    return %arg0, %c0_i32, %c0_i32_0 : i32, i32, i32
  }
}

</mosaic_0001>

<bundles_post_ra>
// kernel: tpu_custom_call.1
= control target key start
LH: loop header
LB: loop body
LE: loop exit
PB: predicated region body
PF: predicated region fallthrough
CT: control target
= control target key end

     0   :  { %7 = vsyncpa [#allocation3], 0  ;;  %s343_s0 = inlined_call_operand.hbm [shape: f32[16,128], index: 0, kind: input, shape index: {}]   ;;  %s344_s1 = inlined_call_operand.hbm [shape: f32[16,128], index: 1, kind: input, shape index: {}]   ;;  %s345_s2 = inlined_call_operand.hbm [shape: f32[1,8,128], index: 2, kind: output, shape index: {}]  }
   0x1   :  { %8 = vsyncpa [#allocation6], 0 }
   0x2   :  { %9 = vsyncpa [#allocation4], 0  ;;  %s278_s9 = smov [#allocation2]   ;;  %s206_s13 = scalar_lea.hbm %s343_s0, 256 }
   0x3   :  { %s21_s10 = sshll.u32 %s278_s9, 4  ;;  %p207_p0 = scmp.ne.s32.totalorder %s343_s0, %s206_s13  ;;  %s22_s10 = int_to_ptr.vmem [resolvable:$true] %s21_s10 }
   0x4   :  { %p210_p1 = scmp.lt.u32.totalorder %s206_s13, %s343_s0 }
   0x6   :  { %p212_p2 = pnand %p210_p1, %p207_p0 }
   0x8   :  { %215 = shalt.err (!%p212_p2)
}
   0x9   :  { %s216_s18 = scalar_lea.vmem %s22_s10, 256  ;;  %p221_p4 = scmp.lt.s32.totalorder %s22_s10, %s22_s10 }
   0xa   :  { %p217_p3 = scmp.ne.s32.totalorder %s22_s10, %s216_s18  ;;  %p222_p5 = scmp.lt.s32.totalorder %s216_s18, %s216_s18 }
   0xc   :  { %p223_p6 = por %p222_p5, %p221_p4 }
   0xe   :  { %p224_p7 = pnand %p223_p6, %p217_p3 }
  0x10   :  { %227 = shalt.err (!%p224_p7)
}
  0x11   :  { %s279_s19 = smov 128   ;;  %s280_s20 = smov 8  }
  0x12   :  { %27 = dma.hbm_to_vmem [thread:$0]  %s343_s0, 256, %s22_s10, [#allocation3], %s279_s19, %s279_s19, %s280_s20  }
  0x13   :  { %s281_s23 = smov [#allocation5]   ;;  %s228_s27 = scalar_lea.hbm %s344_s1, 256 }
  0x14   :  { %s39_s24 = sshll.u32 %s281_s23, 4  ;;  %p229_p8 = scmp.ne.s32.totalorder %s344_s1, %s228_s27  ;;  %s40_s24 = int_to_ptr.vmem [resolvable:$true] %s39_s24 }
  0x15   :  { %p232_p9 = scmp.lt.u32.totalorder %s228_s27, %s344_s1 }
  0x17   :  { %p234_p10 = pnand %p232_p9, %p229_p8 }
  0x19   :  { %237 = shalt.err (!%p234_p10)
}
  0x1a   :  { %s238_s4 = scalar_lea.vmem %s40_s24, 256  ;;  %p243_p12 = scmp.lt.s32.totalorder %s40_s24, %s40_s24 }
  0x1b   :  { %p239_p11 = scmp.ne.s32.totalorder %s40_s24, %s238_s4  ;;  %p244_p13 = scmp.lt.s32.totalorder %s238_s4, %s238_s4 }
  0x1d   :  { %p245_p0 = por %p244_p13, %p243_p12 }
  0x1f   :  { %p246_p1 = pnand %p245_p0, %p239_p11 }
  0x21   :  { %249 = shalt.err (!%p246_p1)
}
  0x22   :  { %45 = dma.hbm_to_vmem [thread:$0]  %s344_s1, 256, %s40_s24, [#allocation6], %s279_s19, %s279_s19, %s280_s20  }
  0x23   :  { %272 = dma.done.wait [#allocation3], 256  }
  0x24   :  { %273 = vsyncadd [#allocation3], 4294967040 }
  0x25   :  { %274 = dma.done.wait [#allocation6], 256  }
  0x26   :  { %275 = vsyncadd [#allocation6], 4294967040  ;;  %v67_v0 = vlaneseq  ;;  %v81_v7 = vld [vmem:[#allocation2] sm:$0xff]  ;;  %v83_v8 = vld [vmem:[#allocation5] sm:$0xff]  ;;  %v282_v25 = vmov 0.0   ;;  %vm161_vm10 = vcmask 1040384  }
  0x27   :  { %v82_v10 = vld [vmem:[#allocation2 + $0x8] sm:$0xff]  ;;  %v84_v11 = vld [vmem:[#allocation5 + $0x8] sm:$0xff]  ;;  %vm89_vm1 = vcmp.eq.f32.partialorder %v83_v8, 0.0  ;;  %vm85_vm2 = vcmp.eq.f32.partialorder %v83_v8, 1.0  ;;  %vm163_vm11 = vcmask 1041408   ;;  %vm165_vm12 = vcmask 1042432  }
  0x28   :  { %v68_v1 = vshrl.u32 %v67_v0, 7  ;;  %v74_v2 = vand.u32 127, %v67_v0  ;;  %vm90_vm4 = vcmp.eq.f32.partialorder %v84_v11, 0.0  ;;  %vm86_vm5 = vcmp.eq.f32.partialorder %v84_v11, 1.0  ;;  %s283_s1 = smov [#allocation7]  }
  0x29   :  { %vm167_vm13 = vcmask 1043456   ;;  %s178_s6 = sshll.u32 %s283_s1, 4  ;;  %s179_s6 = int_to_ptr.vmem [resolvable:$true] %s178_s6 }
  0x2a   :  { %v69_v3 = vadd.s32 8, %v68_v1  ;;  %v75_v4 = vmul.u32 128, %v68_v1  ;;  %s250_s7 = scalar_lea.vmem %s179_s6, 128  ;;  %p255_p3 = scmp.lt.s32.totalorder %s179_s6, %s179_s6 }
  0x2b   :  { %p251_p2 = scmp.ne.s32.totalorder %s179_s6, %s250_s7  ;;  %p256_p4 = scmp.lt.s32.totalorder %s250_s7, %s250_s7 }
  0x2c   :  { %v76_v5 = vmul.u32 128, %v69_v3  ;;  %v77_v6 = vadd.s32 %v75_v4, %v74_v2 }
  0x2d   :  { %p257_p5 = por %p256_p4, %p255_p3 }
  0x2e   :  { %v78_v9 = vadd.s32 %v76_v5, %v74_v2  ;;  %vm79_vm0 = vcmp.lt.s32.totalorder %v77_v6, 2048 }
  0x2f   :  { %v101_v12 = vsel %vm79_vm0, %v81_v7, 0.0  ;;  %vm323_vm6 = vmand %vm89_vm1, %vm79_vm0  ;;  %p258_p6 = pnand %p257_p5, %p251_p2 }
  0x30   :  { %vm80_vm3 = vcmp.lt.s32.totalorder %v78_v9, 2048  ;;  %v105_v13 = vsub.f32 1.0, %v101_v12  ;;  %v103_v16 = vadd.f32 1e-08, %v101_v12  ;;  %vm87_vm7 = vmand %vm85_vm2, %vm79_vm0  ;;  %v194_v27 = vsel %vm323_vm6, 1.0, %v282_v25 }
  0x31   :  { %v102_v15 = vsel %vm80_vm3, %v82_v10, 0.0  ;;  %vm92_vm8 = vmand %vm90_vm4, %vm80_vm3  ;;  %v192_v26 = vsel %vm87_vm7, 1.0, %v282_v25  ;;  %v123_v31 = vmul.f32 %v101_v12, %v101_v12 }
  0x32   :  { %v106_v17 = vsub.f32 1.0, %v102_v15  ;;  %v107_v18 = vadd.f32 1e-08, %v105_v13  ;;  %v104_v19 = vadd.f32 1e-08, %v102_v15  ;;  %vm88_vm9 = vmand %vm86_vm5, %vm80_vm3  ;;  %v195_v29 = vsel %vm92_vm8, 1.0, %v282_v25 }
  0x33   :  { %v193_v28 = vsel %vm88_vm9, 1.0, %v282_v25  ;;  %v117_v30 = vmul.f32 %v105_v13, %v105_v13  ;;  %v154_v33 = vadd.f32 %v195_v29, %v194_v27  ;;  %v124_v35 = vmul.f32 %v102_v15, %v102_v15 }
  0x34   :  { %v108_v20 = vadd.f32 1e-08, %v106_v17  ;;  %v109_v21 = vsel %vm323_vm6, %v107_v18, 1.0  ;;  %v147_v32 = vadd.f32 %v193_v28, %v192_v26  ;;  %v118_v34 = vmul.f32 %v106_v17, %v106_v17 }
  0x35   :  { %v111_v22 = vsel %vm87_vm7, %v103_v16, %v109_v21  ;;  %v119_v36 = vmul.f32 -0.5, %v117_v30  ;;  %v125_v37 = vmul.f32 -0.5, %v123_v31  ;;  %v155_v40 = vrot.slane %v154_v33, 4 }
  0x36   :  { %v110_v23 = vsel %vm92_vm8, %v108_v20, 1.0  ;;  %202 = vlog2.f32 %v111_v22  ;;  %v148_v39 = vrot.slane %v147_v32, 4  ;;  %v120_v42 = vmul.f32 -0.5, %v118_v34 }
  0x37   :  { %v112_v24 = vsel %vm88_vm9, %v104_v19, %v110_v23  ;;  %v126_v43 = vmul.f32 -0.5, %v124_v35  ;;  %v156_v49 = vadd.f32 %v155_v40, %v154_v33 }
  0x38   :  { %204 = vlog2.f32 %v112_v24  ;;  %v149_v48 = vadd.f32 %v148_v39, %v147_v32 }
  0x39   :  { %v157_v59 = vrot.slane %v156_v49, 2 }
  0x3a   :  { %v150_v56 = vrot.slane %v149_v48, 2 }
  0x3b   :  { %v158_v1 = vadd.f32 %v157_v59, %v156_v49 }
  0x3c   :  { %v151_v62 = vadd.f32 %v150_v56, %v149_v48 }
  0x3d   :  { %v159_v7 = vrot.slane %v158_v1, 1 }
  0x3e   :  { %v152_v4 = vrot.slane %v151_v62, 1 }
  0x3f   :  { %v160_v13 = vadd.f32 %v159_v7, %v158_v1 }
  0x40   :  { %v203_v38 = vpop.eup %202  ;;  %v153_v10 = vadd.f32 %v152_v4, %v151_v62 }
  0x41   :  { %v114_v41 = vmul.f32 0.6931472, %v203_v38 }
  0x42   :  { %v205_v44 = vpop.eup %204 }
  0x43   :  { %v116_v45 = vmul.f32 0.6931472, %v205_v44  ;;  %v121_v46 = vmul.f32 %v119_v36, %v114_v41  ;;  %v127_v47 = vmul.f32 %v125_v37, %v114_v41 }
  0x45   :  { %v122_v50 = vmul.f32 %v120_v42, %v116_v45  ;;  %v128_v51 = vmul.f32 %v126_v43, %v116_v45  ;;  %v129_v52 = vmul.f32 %v192_v26, %v121_v46  ;;  %v138_v53 = vmul.f32 %v194_v27, %v127_v47 }
  0x47   :  { %v130_v54 = vmul.f32 %v193_v28, %v122_v50  ;;  %v139_v55 = vmul.f32 %v195_v29, %v128_v51 }
  0x49   :  { %v131_v57 = vadd.f32 %v130_v54, %v129_v52  ;;  %v140_v58 = vadd.f32 %v139_v55, %v138_v53 }
  0x4b   :  { %v132_v60 = vrot.slane %v131_v57, 4  ;;  %v141_v61 = vrot.slane %v140_v58, 4 }
  0x4d   :  { %v133_v63 = vadd.f32 %v132_v60, %v131_v57  ;;  %v142_v0 = vadd.f32 %v141_v61, %v140_v58 }
  0x4f   :  { %v134_v2 = vrot.slane %v133_v63, 2  ;;  %v143_v3 = vrot.slane %v142_v0, 2 }
  0x51   :  { %v135_v5 = vadd.f32 %v134_v2, %v133_v63  ;;  %v144_v6 = vadd.f32 %v143_v3, %v142_v0 }
  0x53   :  { %v136_v8 = vrot.slane %v135_v5, 1  ;;  %v145_v9 = vrot.slane %v144_v6, 1 }
  0x55   :  { %v137_v11 = vadd.f32 %v136_v8, %v135_v5  ;;  %v146_v12 = vadd.f32 %v145_v9, %v144_v6 }
  0x57   :  { %v162_v14 = vsel %vm161_vm10, %v137_v11, %v146_v12 }
  0x58   :  { %v164_v15 = vsel %vm163_vm11, %v162_v14, %v153_v10 }
  0x59   :  { %v166_v16 = vsel %vm165_vm12, %v164_v15, %v160_v13 }
  0x5a   :  { %v168_v17 = vsel %vm167_vm13, %v166_v16, 0.0 }
  0x5b   :  { %171 = vst [vmem:[#allocation7] sm:$0xff] %v168_v17 }
  0x5c   :  { %261 = shalt.err (!%p258_p6)
}
  0x5d   :  { %s262_s10 = scalar_lea.hbm %s345_s2, 128 }
  0x5e   :  { %p263_p7 = scmp.ne.s32.totalorder %s345_s2, %s262_s10  ;;  %p266_p8 = scmp.lt.u32.totalorder %s262_s10, %s345_s2 }
  0x60   :  { %p268_p9 = pnand %p266_p8, %p263_p7 }
  0x62   :  { %271 = shalt.err (!%p268_p9)
}
  0x63   :  { %181 = dma.vmem_to_hbm [thread:$0]  %s179_s6, 128, %s345_s2, [#allocation4]  }
  0x64   :  { %276 = dma.done.wait [#allocation4], 128  }
  0x65   :  { %277 = vsyncadd [#allocation4], 4294967168 }
  0x66   :  { %185 = vsyncpa [#allocation3], 1 }
  0x67   :  { %186 = vsyncpa [#allocation6], 1 }
  0x68   :  { %187 = vsyncpa [#allocation4], 1 }

</bundles_post_ra>
